<compile_context>
chip_gen: v7x
topology: tpu7x:2x2x1
jax: 0.10.0
libtpu: 0.0.40
codegen_flags: <defaults>
</compile_context>

<pallas_src>
import math
import jax
import jax.numpy as jnp
from jax import lax
from jax.experimental import pallas as pl
from jax.experimental.pallas import tpu as pltpu


def _round_up(x, m):
    return ((x + m - 1) // m) * m


def _conv_kernel(p_ref, w_ref, b_ref, o_ref):
    # p_ref: (1, CK, TL)        im2col patches for this (group, lane tile)
    # w_ref: (1, C_out_g, CK)   weights for this group (resident across tiles)
    # b_ref: (1, C_out_g, 1)    bias for this group
    # o_ref: (1, C_out_g, TL)
    acc = jnp.dot(w_ref[0], p_ref[0], preferred_element_type=jnp.float32)
    o_ref[0] = (acc + b_ref[0]).astype(o_ref.dtype)


def _choose_lane_tile(M, CK, C_out_g, itemsize=4, budget=12 * 1024 * 1024):
    """Largest lane tile (multiple of 128, <= 2048) whose double-buffered
    input+output tiles fit comfortably in the scoped-VMEM budget."""
    cap = min(2048, _round_up(M, 128))
    per_lane = 2 * (CK + C_out_g) * itemsize  # double-buffered in + out bytes/lane
    t = cap
    while t > 128 and t * per_lane > budget:
        t -= 128
    return max(t, 128)


def conv1d_pad(x, weight, bias, *, kernel_size, stride, groups=1):
    """Equivalent of Conv1dPad.forward.

    x:      (N, C_in, L)            float32
    weight: (C_out, C_in // groups, K)
    bias:   (C_out,)
    returns (N, C_out, L_out) with L_out = ceil(L / stride)
    """
    N, C_in, L = x.shape
    C_out = weight.shape[0]
    K = kernel_size
    G = groups
    C_in_g = C_in // G
    C_out_g = C_out // G
    CK = C_in_g * K

    # --- "same" padding exactly as in the PyTorch module ---
    out_dim = (L + stride - 1) // stride
    p = max(0, (out_dim - 1) * stride + K - L)
    pad_left = p // 2
    pad_right = p - pad_left
    x_pad = jnp.pad(x, ((0, 0), (0, 0), (pad_left, pad_right)))
    L_out = out_dim

    # --- im2col (glue, plain JAX), batch folded into the lane axis ---
    x_pad_g = x_pad.reshape(N, G, C_in_g, L + p)
    t_idx = jnp.arange(L_out) * stride                       # (L_out,)
    taps = [x_pad_g[..., t_idx + k] for k in range(K)]       # K x (N,G,C_in_g,L_out)
    # (N, G, C_in_g, K, L_out) -> (G, C_in_g, K, N, L_out) -> (G, CK, N*L_out)
    patches = jnp.stack(taps, axis=3)
    patches = jnp.transpose(patches, (1, 2, 3, 0, 4)).reshape(G, CK, N * L_out)

    M = N * L_out
    TL = _choose_lane_tile(M, CK, C_out_g)
    M_pad = _round_up(M, TL)
    if M_pad != M:
        patches = jnp.pad(patches, ((0, 0), (0, 0), (0, M_pad - M)))

    w_g = weight.reshape(G, C_out_g, CK)                     # (G, C_out_g, CK)
    b_g = bias.reshape(G, C_out_g, 1)                        # (G, C_out_g, 1)

    num_tiles = M_pad // TL

    out = pl.pallas_call(
        _conv_kernel,
        out_shape=jax.ShapeDtypeStruct((G, C_out_g, M_pad), x.dtype),
        grid_spec=pl.GridSpec(
            # lane tiles innermost so weight/bias block indices are constant
            # across consecutive steps (no per-step weight re-DMA).
            grid=(G, num_tiles),
            in_specs=[
                pl.BlockSpec((1, CK, TL), lambda g, t: (g, 0, t)),
                pl.BlockSpec((1, C_out_g, CK), lambda g, t: (g, 0, 0)),
                pl.BlockSpec((1, C_out_g, 1), lambda g, t: (g, 0, 0)),
            ],
            out_specs=pl.BlockSpec((1, C_out_g, TL), lambda g, t: (g, 0, t)),
        ),
        compiler_params=pltpu.CompilerParams(
            dimension_semantics=("parallel", "parallel"),
            vmem_limit_bytes=32 * 1024 * 1024,
        ),
    )(patches, w_g, b_g)

    # (G, C_out_g, N*L_out) -> (N, C_out, L_out)
    out = out[:, :, :M].reshape(G, C_out_g, N, L_out)
    out = jnp.transpose(out, (2, 0, 1, 3)).reshape(N, C_out, L_out)
    return out


def _reference(x, weight, bias, *, kernel_size, stride, groups):
    """Pure-JAX reference matching F.pad + nn.Conv1d."""
    L = x.shape[-1]
    out_dim = (L + stride - 1) // stride
    p = max(0, (out_dim - 1) * stride + kernel_size - L)
    pad_left = p // 2
    pad_right = p - pad_left
    y = lax.conv_general_dilated(
        x, weight,
        window_strides=(stride,),
        padding=[(pad_left, pad_right)],
        dimension_numbers=("NCH", "OIH", "NCH"),
        feature_group_count=groups,
    )
    return y + bias[None, :, None]


def _run_case(key, N, C_in, C_out, L, K, stride, groups):
    kx, kw, kb = jax.random.split(key, 3)
    x = jax.random.normal(kx, (N, C_in, L), dtype=jnp.float32)

    # PyTorch-like init: U(-bound, bound), bound = 1/sqrt(fan_in)
    fan_in = (C_in // groups) * K
    bound = 1.0 / math.sqrt(fan_in)
    weight = jax.random.uniform(kw, (C_out, C_in // groups, K),
                                minval=-bound, maxval=bound, dtype=jnp.float32)
    bias = jax.random.uniform(kb, (C_out,),
                              minval=-bound, maxval=bound, dtype=jnp.float32)

    y = conv1d_pad(x, weight, bias, kernel_size=K, stride=stride, groups=groups)
    y = jax.block_until_ready(y)

    y_ref = _reference(x, weight, bias, kernel_size=K, stride=stride,
                       groups=groups)
    L_out = (L + stride - 1) // stride
    assert y.shape == y_ref.shape == (N, C_out, L_out)
    assert jnp.allclose(y, y_ref, atol=1e-5, rtol=1e-5)


if __name__ == "__main__":
    key = jax.random.PRNGKey(0)
    k1, k2 = jax.random.split(key)

    # Small, module-consistent shapes.
    _run_case(k1, N=2, C_in=4, C_out=8, L=16, K=3, stride=2, groups=1)
    _run_case(k2, N=2, C_in=4, C_out=8, L=16, K=5, stride=1, groups=2)

    print("KERNEL_OK")
</pallas_src>

<mosaic_0001>
module attributes {stable_mosaic.version = 11 : i64} {
  func.func @_conv_kernel(%arg0: i32, %arg1: i32, %arg2: memref<1x12x128xf32, #tpu.memory_space<vmem>>, %arg3: memref<1x8x12xf32, #tpu.memory_space<vmem>>, %arg4: memref<1x8x1xf32, #tpu.memory_space<vmem>>, %arg5: memref<1x8x128xf32, #tpu.memory_space<vmem>>) attributes {dimension_semantics = [#tpu.dimension_semantics<parallel>, #tpu.dimension_semantics<parallel>], iteration_bounds = array<i64: 1, 1>, scalar_prefetch = 0 : i64, scratch_operands = 0 : i64, tpu.core_type = #tpu.core_type<tc>, window_params = [{transform_indices = @transform_0, window_bounds = array<i64: 1, 12, 128>}, {transform_indices = @transform_1, window_bounds = array<i64: 1, 8, 12>}, {transform_indices = @transform_2, window_bounds = array<i64: 1, 8, 1>}, {transform_indices = @transform_3, window_bounds = array<i64: 1, 8, 128>}]} {
    %c0 = arith.constant 0 : index
    %c0_0 = arith.constant 0 : index
    %c0_1 = arith.constant 0 : index
    %0 = vector.load %arg3[%c0, %c0_0, %c0_1] : memref<1x8x12xf32, #tpu.memory_space<vmem>>, vector<1x8x12xf32>
    %1 = vector.shape_cast %0 : vector<1x8x12xf32> to vector<8x12xf32>
    %c0_2 = arith.constant 0 : index
    %c0_3 = arith.constant 0 : index
    %c0_4 = arith.constant 0 : index
    %2 = vector.load %arg2[%c0_2, %c0_3, %c0_4] : memref<1x12x128xf32, #tpu.memory_space<vmem>>, vector<1x12x128xf32>
    %3 = vector.shape_cast %2 : vector<1x12x128xf32> to vector<12x128xf32>
    %cst = arith.constant dense<0.000000e+00> : vector<8x128xf32>
    %4 = tpu.matmul %1, %3, %cst {dimension_numbers = #tpu.dot_dimension_numbers<[1], [0], [0], [1], [0, 0, 1, 1], [], []>} : vector<8x12xf32>, vector<12x128xf32>, vector<8x128xf32> -> vector<8x128xf32>
    %c0_5 = arith.constant 0 : index
    %c0_6 = arith.constant 0 : index
    %c0_7 = arith.constant 0 : index
    %5 = vector.load %arg4[%c0_5, %c0_6, %c0_7] : memref<1x8x1xf32, #tpu.memory_space<vmem>>, vector<1x8x1xf32>
    %6 = vector.shape_cast %5 : vector<1x8x1xf32> to vector<8x1xf32>
    %7 = vector.broadcast %6 : vector<8x1xf32> to vector<8x128xf32>
    %8 = arith.addf %4, %7 : vector<8x128xf32>
    %c0_8 = arith.constant 0 : index
    %c0_9 = arith.constant 0 : index
    %c0_10 = arith.constant 0 : index
    %9 = vector.load %arg5[%c0_8, %c0_9, %c0_10] : memref<1x8x128xf32, #tpu.memory_space<vmem>>, vector<1x8x128xf32>
    %10 = vector.shape_cast %9 : vector<1x8x128xf32> to vector<8x128xf32>
    %11 = vector.shape_cast %8 : vector<8x128xf32> to vector<1x8x128xf32>
    tpu.vector_store %arg5[%c0_8, %c0_9, %c0_10], %11 {strides = array<i32>} : memref<1x8x128xf32, #tpu.memory_space<vmem>>, vector<1x8x128xf32>,
    return
  }
  func.func @transform_0(%arg0: i32, %arg1: i32) -> (i32, i32, i32) {
    %c0_i32 = arith.constant 0 : i32
    %c0_i32_0 = arith.constant 0 : i32
    return %arg0, %c0_i32, %arg1 : i32, i32, i32
  }
  func.func @transform_1(%arg0: i32, %arg1: i32) -> (i32, i32, i32) {
    %c0_i32 = arith.constant 0 : i32
    %c0_i32_0 = arith.constant 0 : i32
    %c0_i32_1 = arith.constant 0 : i32
    return %arg0, %c0_i32, %c0_i32_0 : i32, i32, i32
  }
  func.func @transform_2(%arg0: i32, %arg1: i32) -> (i32, i32, i32) {
    %c0_i32 = arith.constant 0 : i32
    %c0_i32_0 = arith.constant 0 : i32
    %c0_i32_1 = arith.constant 0 : i32
    return %arg0, %c0_i32, %c0_i32_0 : i32, i32, i32
  }
  func.func @transform_3(%arg0: i32, %arg1: i32) -> (i32, i32, i32) {
    %c0_i32 = arith.constant 0 : i32
    %c0_i32_0 = arith.constant 0 : i32
    return %arg0, %c0_i32, %arg1 : i32, i32, i32
  }
}

</mosaic_0001>

<bundles_post_ra>
// kernel: tpu_custom_call.1
= control target key start
LH: loop header
LB: loop body
LE: loop exit
PB: predicated region body
PF: predicated region fallthrough
CT: control target
= control target key end

     0   :  { %vm28_vm0 = vcmask 1043456   ;;  %v164_v2 = vmov 0.0|0.0   ;;  %vm165_vm1 = vmmov 1   ;;  %vm166_vm3 = vmmov 0   ;;  %s214_s0 = inlined_call_operand.vmem [shape: f32[1,12,128], index: 0, kind: input, shape index: {}]   ;;  %s215_s1 = inlined_call_operand.vmem [shape: f32[1,8,12], index: 1, kind: input, shape index: {}]   ;;  %s216_s2 = inlined_call_operand.vmem [shape: f32[1,8,1], index: 2, kind: input, shape index: {}]   ;;  %s217_s3 = inlined_call_operand.hbm [shape: f32[1,8,128], index: 3, kind: output, shape index: {}]  }
   0x1   :  { %v16_v0 = vld [vmem:[%s214_s0] sm:$0xff]  ;;  %v17_v1 = vld [vmem:[%s214_s0 + $0x8] sm:$0xf]  ;;  %129 = vmatprep.subr.bf16.mxu0 %v164_v2  ;;  %vm131_vm2 = vmpackc.low %vm28_vm0, %vm165_vm1  ;;  %v167_v5 = vmov 0.0  }
   0x2   :  { %v130_v3 = vpack.c.bf16 %v17_v1, %v16_v0  ;;  %v18_v4 = vld [vmem:[%s216_s2] sm:$0xff]  ;;  %126 = vmatprep.mubr.msk.f32.mxu0 %vm166_vm3, %v167_v5 }
   0x3   :  { %8 = vsyncpa [#allocation3], 0  ;;  %v15_v6 = vld [vmem:[%s215_s1] sm:$0xff]  ;;  %vm24_vm4 = vcmask 97280   ;;  %v168_v7 = vmov 0   ;;  %s169_s0 = smov [#allocation2]  }
   0x4   :  { %132 = vmatpush3.bf16.msk.msra.mxu0 %vm131_vm2, %v130_v3  ;;  %139 = vset.pattern.permute.xlu0 %v168_v7  ;;  %s109_s20 = sshll.u32 %s169_s0, 4  ;;  %s110_s20 = int_to_ptr.vmem [resolvable:$true] %s109_s20 }
   0x5   :  { %21 = vperm.xlu0 %139, %v18_v4   ;;  %s140_s2 = scalar_lea.vmem %s110_s20, 128  ;;  %p145_p1 = scmp.lt.s32.totalorder %s110_s20, %s110_s20 }
   0x6   :  { %p141_p0 = scmp.ne.s32.totalorder %s110_s20, %s140_s2  ;;  %p146_p2 = scmp.lt.s32.totalorder %s140_s2, %s140_s2 }
   0x7   :  { %127 = vmatmul.mubr.msk.f32.vlgmr.msra.gmra.mrb[0].mxu0 %vm24_vm4, %v15_v6 }
   0x8   :  { %p147_p3 = por %p146_p2, %p145_p1 }
   0xa   :  { %p148_p4 = pnand %p147_p3, %p141_p0 }
  0x84   :  { %v22_v8 = vpop.permute.xlu0 %21 }
  0xda   :  { %v98_v9 = vpop.f32.mrb[0].mxu0 }
  0xdb   :  { %v99_v10 = vadd.f32 %v98_v9, %v22_v8  ;;  %v128_v11 = vpop.f32.mrb[1].mxu0 }
  0xdd   :  { %102 = vst [vmem:[#allocation2] sm:$0xff] %v99_v10 }
  0xde   :  { %151 = shalt.err (!%p148_p4)
}
  0xdf   :  { %s152_s22 = scalar_lea.hbm %s217_s3, 128 }
  0xe0   :  { %p153_p5 = scmp.ne.s32.totalorder %s217_s3, %s152_s22  ;;  %p156_p6 = scmp.lt.u32.totalorder %s152_s22, %s217_s3 }
  0xe2   :  { %p158_p7 = pnand %p156_p6, %p153_p5 }
  0xe4   :  { %161 = shalt.err (!%p158_p7)
}
  0xe5   :  { %112 = dma.vmem_to_hbm [thread:$0]  %s110_s20, 128, %s217_s3, [#allocation3]  }
  0xe6   :  { %162 = dma.done.wait [#allocation3], 128  }
  0xe7   :  { %163 = vsyncadd [#allocation3], 4294967168 }
  0xe8   :  { %116 = vsyncpa [#allocation3], 1 }

</bundles_post_ra>
